<compile_context>
chip_gen: v6e
topology: v6e:2x2x1
jax: 0.10.0
libtpu: 0.0.40
codegen_flags: <defaults>
</compile_context>

<pallas_src>
import jax
import jax.numpy as jnp
from jax.experimental import pallas as pl
from jax.experimental.pallas import tpu as pltpu


D_IN = 20
D_HID = 256
D_OUT = 10
D_OUT_PAD = 128          # lane-dense padded output width (minimum lane-dense width)
MAX_TB = 2048            # batch tile cap; ~5 MB VMEM at TB=2048, safe on all generations


def _round_up(x, m):
    return ((x + m - 1) // m) * m


def _pick_tile(B):
    """Batch tile: multiple of 8 (sublane). For non-trivial batches, force at
    least 2 grid steps so v7x's second TensorCore gets work and the next-x DMA
    overlaps compute; cap at MAX_TB for VMEM."""
    B = max(B, 1)
    if B < 16:
        return _round_up(B, 8)
    return min(MAX_TB, _round_up(pl.cdiv(B, 2), 8))


def mlp_kernel(x_ref, w1_ref, b1_ref, w2_ref, b2_ref, o_ref):
    # hidden = relu(x @ W1 + b1)   (f32 MXU accumulation)
    h = jnp.dot(x_ref[...], w1_ref[...], preferred_element_type=jnp.float32)
    h = jnp.maximum(h + b1_ref[...], 0.0)       # b1 is (1, 256), broadcasts over batch
    # out = hidden @ W2_pad + b2_pad  (columns 10..127 are zero by construction)
    o = jnp.dot(h, w2_ref[...], preferred_element_type=jnp.float32)
    o_ref[...] = (o + b2_ref[...]).astype(o_ref.dtype)


def prepare_params(w1, b1, w2, b2):
    """One-time layout prep: 2-D biases, zero-pad second layer to lane-dense
    (256, 128) / (1, 128)."""
    assert w1.shape == (D_IN, D_HID) and b1.shape == (D_HID,)
    assert w2.shape == (D_HID, D_OUT) and b2.shape == (D_OUT,)
    b1_2d = b1.reshape(1, D_HID)
    w2_pad = jnp.zeros((D_HID, D_OUT_PAD), w2.dtype).at[:, :D_OUT].set(w2)
    b2_pad = jnp.zeros((1, D_OUT_PAD), b2.dtype).at[0, :D_OUT].set(b2)
    return w1, b1_2d, w2_pad, b2_pad


def mlp_forward(x, params):
    w1, b1_2d, w2_pad, b2_pad = params
    B, d_in = x.shape
    assert d_in == D_IN

    TB = _pick_tile(B)
    B_pad = _round_up(max(B, 1), TB)
    if B_pad != B:
        # Only pads when B isn't tile-aligned (small/odd batches); padded rows
        # compute garbage that is sliced off below.
        x = jnp.pad(x, ((0, B_pad - B), (0, 0)))

    resident = dict(pipeline_mode=pl.Buffered(1))   # params DMA'd once; no 2nd buffer

    out_padded = pl.pallas_call(
        mlp_kernel,
        out_shape=jax.ShapeDtypeStruct((B_pad, D_OUT_PAD), x.dtype),
        grid=(B_pad // TB,),
        in_specs=[
            # x: tiled over batch, pipelined/double-buffered by BlockSpec
            pl.BlockSpec((TB, D_IN), lambda i: (i, 0)),
            # weights & biases: resident across all grid steps (~150 KB total)
            pl.BlockSpec((D_IN, D_HID), lambda i: (0, 0), **resident),
            pl.BlockSpec((1, D_HID), lambda i: (0, 0), **resident),
            pl.BlockSpec((D_HID, D_OUT_PAD), lambda i: (0, 0), **resident),
            pl.BlockSpec((1, D_OUT_PAD), lambda i: (0, 0), **resident),
        ],
        out_specs=pl.BlockSpec((TB, D_OUT_PAD), lambda i: (i, 0)),
        compiler_params=pltpu.CompilerParams(
            # Batch axis is embarrassingly parallel -> megacore sharding on v7x
            # (>=2 grid steps guaranteed by _pick_tile for non-trivial B).
            dimension_semantics=("parallel",),
        ),
    )(x, w1, b1_2d, w2_pad, b2_pad)

    return out_padded[:B, :D_OUT]


def init_params(key, d_in=D_IN, d_hid=D_HID, d_out=D_OUT):
    """Deterministic init mirroring PyTorch nn.Linear default (uniform +-1/sqrt(fan_in))."""
    k1, k2, k3, k4 = jax.random.split(key, 4)
    bound1 = 1.0 / jnp.sqrt(d_in)
    bound2 = 1.0 / jnp.sqrt(d_hid)
    w1 = jax.random.uniform(k1, (d_in, d_hid), jnp.float32, -bound1, bound1)
    b1 = jax.random.uniform(k2, (d_hid,), jnp.float32, -bound1, bound1)
    w2 = jax.random.uniform(k3, (d_hid, d_out), jnp.float32, -bound2, bound2)
    b2 = jax.random.uniform(k4, (d_out,), jnp.float32, -bound2, bound2)
    return w1, b1, w2, b2


def _reference(x, w1, b1, w2, b2):
    return jnp.maximum(x @ w1 + b1, 0.0) @ w2 + b2


if __name__ == "__main__":
    key = jax.random.PRNGKey(0)
    kx, kp, kx2 = jax.random.split(key, 3)

    w1, b1, w2, b2 = init_params(kp)
    params = prepare_params(w1, b1, w2, b2)

    # Small batch (matches the module's intended usage).
    batch = 2
    x = jax.random.normal(kx, (batch, D_IN), jnp.float32)
    out = jax.block_until_ready(mlp_forward(x, params))
    ref = _reference(x, w1, b1, w2, b2)
    assert out.shape == (batch, D_OUT)
    assert jnp.allclose(out, ref, atol=1e-5, rtol=1e-5)

    # Multi-tile batch path: tile-aligned (no pad pass), grid=(2,) -> both v7x TCs used.
    batch2 = 1024
    x2 = jax.random.normal(kx2, (batch2, D_IN), jnp.float32)
    out2 = jax.block_until_ready(mlp_forward(x2, params))
    ref2 = _reference(x2, w1, b1, w2, b2)
    assert out2.shape == (batch2, D_OUT)
    assert jnp.allclose(out2, ref2, atol=1e-4, rtol=1e-4)

    print("KERNEL_OK")
</pallas_src>

<mosaic_0001>
module attributes {stable_mosaic.version = 11 : i64} {
  func.func @mlp_kernel(%arg0: i32, %arg1: memref<8x20xf32, #tpu.memory_space<vmem>>, %arg2: memref<20x256xf32, #tpu.memory_space<vmem>>, %arg3: memref<1x256xf32, #tpu.memory_space<vmem>>, %arg4: memref<256x128xf32, #tpu.memory_space<vmem>>, %arg5: memref<1x128xf32, #tpu.memory_space<vmem>>, %arg6: memref<8x128xf32, #tpu.memory_space<vmem>>) attributes {dimension_semantics = [#tpu.dimension_semantics<parallel>], iteration_bounds = array<i64: 1>, scalar_prefetch = 0 : i64, scratch_operands = 0 : i64, tpu.core_type = #tpu.core_type<tc>, window_params = [{transform_indices = @transform_0, window_bounds = array<i64: 8, 20>}, {pipeline_mode = #tpu.pipeline_mode<synchronous>, transform_indices = @transform_1, window_bounds = array<i64: 20, 256>}, {pipeline_mode = #tpu.pipeline_mode<synchronous>, transform_indices = @transform_2, window_bounds = array<i64: 1, 256>}, {pipeline_mode = #tpu.pipeline_mode<synchronous>, transform_indices = @transform_3, window_bounds = array<i64: 256, 128>}, {pipeline_mode = #tpu.pipeline_mode<synchronous>, transform_indices = @transform_4, window_bounds = array<i64: 1, 128>}, {transform_indices = @transform_5, window_bounds = array<i64: 8, 128>}]} {
    %c0 = arith.constant 0 : index
    %c0_0 = arith.constant 0 : index
    %0 = vector.load %arg1[%c0, %c0_0] : memref<8x20xf32, #tpu.memory_space<vmem>>, vector<8x20xf32>
    %c0_1 = arith.constant 0 : index
    %c0_2 = arith.constant 0 : index
    %1 = vector.load %arg2[%c0_1, %c0_2] : memref<20x256xf32, #tpu.memory_space<vmem>>, vector<20x256xf32>
    %cst = arith.constant dense<0.000000e+00> : vector<8x256xf32>
    %2 = tpu.matmul %0, %1, %cst {dimension_numbers = #tpu.dot_dimension_numbers<[1], [0], [0], [1], [0, 0, 1, 1], [], []>} : vector<8x20xf32>, vector<20x256xf32>, vector<8x256xf32> -> vector<8x256xf32>
    %c0_3 = arith.constant 0 : index
    %c0_4 = arith.constant 0 : index
    %3 = vector.load %arg3[%c0_3, %c0_4] : memref<1x256xf32, #tpu.memory_space<vmem>>, vector<1x256xf32>
    %4 = vector.broadcast %3 : vector<1x256xf32> to vector<8x256xf32>
    %5 = arith.addf %2, %4 : vector<8x256xf32>
    %cst_5 = arith.constant 0.000000e+00 : f32
    %6 = vector.broadcast %cst_5 : f32 to vector<8x256xf32>
    %7 = arith.maximumf %5, %6 : vector<8x256xf32>
    %c0_6 = arith.constant 0 : index
    %c0_7 = arith.constant 0 : index
    %8 = vector.load %arg4[%c0_6, %c0_7] : memref<256x128xf32, #tpu.memory_space<vmem>>, vector<256x128xf32>
    %cst_8 = arith.constant dense<0.000000e+00> : vector<8x128xf32>
    %9 = tpu.matmul %7, %8, %cst_8 {dimension_numbers = #tpu.dot_dimension_numbers<[1], [0], [0], [1], [0, 0, 1, 1], [], []>} : vector<8x256xf32>, vector<256x128xf32>, vector<8x128xf32> -> vector<8x128xf32>
    %c0_9 = arith.constant 0 : index
    %c0_10 = arith.constant 0 : index
    %10 = vector.load %arg5[%c0_9, %c0_10] : memref<1x128xf32, #tpu.memory_space<vmem>>, vector<1x128xf32>
    %11 = vector.broadcast %10 : vector<1x128xf32> to vector<8x128xf32>
    %12 = arith.addf %9, %11 : vector<8x128xf32>
    %c0_11 = arith.constant 0 : index
    %c0_12 = arith.constant 0 : index
    %13 = vector.load %arg6[%c0_11, %c0_12] : memref<8x128xf32, #tpu.memory_space<vmem>>, vector<8x128xf32>
    tpu.vector_store %arg6[%c0_11, %c0_12], %12 {strides = array<i32>} : memref<8x128xf32, #tpu.memory_space<vmem>>, vector<8x128xf32>,
    return
  }
  func.func @transform_0(%arg0: i32) -> (i32, i32) {
    %c0_i32 = arith.constant 0 : i32
    %c0_i32_0 = arith.constant 0 : i32
    return %arg0, %c0_i32 : i32, i32
  }
  func.func @transform_1(%arg0: i32) -> (i32, i32) {
    %c0_i32 = arith.constant 0 : i32
    %c0_i32_0 = arith.constant 0 : i32
    %c0_i32_1 = arith.constant 0 : i32
    return %c0_i32, %c0_i32_0 : i32, i32
  }
  func.func @transform_2(%arg0: i32) -> (i32, i32) {
    %c0_i32 = arith.constant 0 : i32
    %c0_i32_0 = arith.constant 0 : i32
    %c0_i32_1 = arith.constant 0 : i32
    return %c0_i32, %c0_i32_0 : i32, i32
  }
  func.func @transform_3(%arg0: i32) -> (i32, i32) {
    %c0_i32 = arith.constant 0 : i32
    %c0_i32_0 = arith.constant 0 : i32
    %c0_i32_1 = arith.constant 0 : i32
    return %c0_i32, %c0_i32_0 : i32, i32
  }
  func.func @transform_4(%arg0: i32) -> (i32, i32) {
    %c0_i32 = arith.constant 0 : i32
    %c0_i32_0 = arith.constant 0 : i32
    %c0_i32_1 = arith.constant 0 : i32
    return %c0_i32, %c0_i32_0 : i32, i32
  }
  func.func @transform_5(%arg0: i32) -> (i32, i32) {
    %c0_i32 = arith.constant 0 : i32
    %c0_i32_0 = arith.constant 0 : i32
    return %arg0, %c0_i32 : i32, i32
  }
}

</mosaic_0001>

<bundles_post_ra>
// kernel: tpu_custom_call.1
= control target key start
LH: loop header
LB: loop body
LE: loop exit
PB: predicated region body
PF: predicated region fallthrough
CT: control target
= control target key end

     0   :  { %10 = vsyncpa [#allocation3], 0  ;;  %s480_s0 = inlined_call_operand.hbm [shape: f32[8,20], index: 0, kind: input, shape index: {}]   ;;  %s481_s1 = inlined_call_operand.hbm [shape: f32[20,256], index: 1, kind: input, shape index: {}]   ;;  %s482_s2 = inlined_call_operand.vmem [shape: f32[1,256], index: 2, kind: input, shape index: {}]   ;;  %s483_s3 = inlined_call_operand.hbm [shape: f32[256,128], index: 3, kind: input, shape index: {}]   ;;  %s484_s4 = inlined_call_operand.vmem [shape: f32[1,128], index: 4, kind: input, shape index: {}]   ;;  %s485_s5 = inlined_call_operand.hbm [shape: f32[8,128], index: 5, kind: output, shape index: {}]  }
   0x1   :  { %11 = vsyncpa [#allocation6], 0 }
   0x2   :  { %12 = vsyncpa [#allocation4], 0  ;;  %s423_s18 = smov [#allocation5]  }
   0x3   :  { %s28_s19 = sshll.u32 %s423_s18, 4  ;;  %s29_s19 = int_to_ptr.vmem [resolvable:$true] %s28_s19 }
   0x4   :  { %s345_s20 = scalar_lea.vmem %s29_s19, 768  ;;  %p350_p1 = scmp.lt.s32.totalorder %s29_s19, %s29_s19 }
   0x5   :  { %p346_p0 = scmp.ne.s32.totalorder %s29_s19, %s345_s20  ;;  %p351_p2 = scmp.lt.s32.totalorder %s345_s20, %s345_s20 }
   0x7   :  { %p352_p3 = por %p351_p2, %p350_p1 }
   0x9   :  { %p353_p4 = pnand %p352_p3, %p346_p0 }
   0xb   :  { %356 = shalt.err (!%p353_p4)
}
   0xc   :  { %s424_s21 = smov 256   ;;  %s425_s22 = smov 16  }
   0xd   :  { %34 = dma.hbm_to_vmem [thread:$0]  %s481_s1, 768, %s29_s19, [#allocation6], %s424_s21, %s424_s21, %s425_s22  }
   0xe   :  { %s426_s25 = smov [#allocation2]   ;;  %s427_s27 = smov [#allocation7]  }
   0xf   :  { %s19_s26 = sshll.u32 %s426_s25, 4  ;;  %s42_s28 = sshll.u32 %s427_s27, 4  ;;  %s20_s26 = int_to_ptr.vmem [resolvable:$true] %s19_s26  ;;  %s43_s28 = int_to_ptr.vmem [resolvable:$true] %s42_s28 }
  0x10   :  { %s365_s29 = scalar_lea.vmem %s20_s26, 128  ;;  %p370_p6 = scmp.lt.s32.totalorder %s20_s26, %s20_s26 }
  0x11   :  { %p366_p5 = scmp.ne.s32.totalorder %s20_s26, %s365_s29  ;;  %p371_p7 = scmp.lt.s32.totalorder %s365_s29, %s365_s29 }
  0x13   :  { %p372_p8 = por %p371_p7, %p370_p6 }
  0x15   :  { %p373_p9 = pnand %p372_p8, %p366_p5 }
  0x17   :  { %376 = shalt.err (!%p373_p9)
}
  0x18   :  { %22 = dma.hbm_to_vmem [thread:$0]  %s480_s0, 128, %s20_s26, [#allocation3]  }
  0x19   :  { %s385_s7 = scalar_lea.vmem %s43_s28, 4096  ;;  %p390_p11 = scmp.lt.s32.totalorder %s43_s28, %s43_s28 }
  0x1a   :  { %p386_p10 = scmp.ne.s32.totalorder %s43_s28, %s385_s7  ;;  %p391_p12 = scmp.lt.s32.totalorder %s385_s7, %s385_s7 }
  0x1c   :  { %p392_p13 = por %p391_p12, %p390_p11 }
  0x1e   :  { %p393_p0 = pnand %p392_p13, %p386_p10 }
  0x20   :  { %396 = shalt.err (!%p393_p0)
}
  0x21   :  { %s428_s1 = smov 128   ;;  %s429_s8 = smov 8  }
  0x22   :  { %48 = dma.hbm_to_vmem [thread:$0]  %s483_s3, 4096, %s43_s28, [#allocation6], %s428_s1, %s428_s1, %s429_s8  }
  0x23   :  { %417 = dma.done.wait [#allocation3], 128  }
  0x24   :  { %418 = vsyncadd [#allocation3], 4294967168 }
  0x25   :  { %419 = dma.done.wait [#allocation6], 4864  }
  0x26   :  { %420 = vsyncadd [#allocation6], 4294962432  ;;  %v430_v0 = vmov 0.0   ;;  %vm83_vm0 = vcmask 1043456   ;;  %v66_v1 = vld [vmem:[#allocation5 + $0x28] sm:$0xf]  ;;  %v69_v40 = vlaneseq }
  0x27   :  { %154 = vmatprep.mubr.f32.mxu0 %v430_v0  ;;  %v65_v2 = vld [vmem:[#allocation5 + $0x20] sm:$0xf]  ;;  %v64_v3 = vld [vmem:[#allocation5 + $0x18] sm:$0xff]  ;;  %289 = vmatprep.subr.msk.mxu0 %vm83_vm0, %v66_v1  ;;  %v63_v4 = vld [vmem:[#allocation5 + $0x10] sm:$0xff]  ;;  %vm79_vm1 = vcmask 162816   ;;  %s431_s13 = smov [#allocation8]  }
  0x28   :  { %290 = vmatpush1.msk.msra.mxu0 %vm83_vm0, %v65_v2  ;;  %v62_v5 = vld [vmem:[#allocation5 + $0x8] sm:$0xff]  ;;  %v61_v8 = vld [vmem:[#allocation5] sm:$0xff]  ;;  %v60_v11 = vld [vmem:[#allocation2] sm:$0xff]  ;;  %v70_v41 = vshrl.u32 %v69_v40, 7  ;;  %s279_s14 = sshll.u32 %s431_s13, 4  ;;  %s280_s14 = int_to_ptr.vmem [resolvable:$true] %s279_s14 }
  0x29   :  { %v194_v6 = vld [vmem:[#allocation7 + $0xf8] sm:$0xff]  ;;  %118 = vmatprep.subr.mxu0 %v64_v3  ;;  %v193_v9 = vld [vmem:[#allocation7 + $0xf0] sm:$0xff]  ;;  %v192_v12 = vld [vmem:[#allocation7 + $0xe8] sm:$0xff]  ;;  %p402_p2 = scmp.lt.s32.totalorder %s280_s14, %s280_s14 }
  0x2a   :  { %v178_v7 = vld [vmem:[#allocation7 + $0x78] sm:$0xff]  ;;  %293 = vmatprep.subr.mxu1 %v194_v6  ;;  %v177_v10 = vld [vmem:[#allocation7 + $0x70] sm:$0xff]  ;;  %119 = vmatpush1.msra.mxu0 %v63_v4  ;;  %v176_v13 = vld [vmem:[#allocation7 + $0x68] sm:$0xff]  ;;  %v71_v42 = vsub.s32 0, %v70_v41  ;;  %v75_v44 = vsub.s32 1, %v70_v41 }
  0x2b   :  { %294 = vmatpush3.msra.mxu1 %v178_v7  ;;  %120 = vmatprep.subr.mxu0 %v62_v5  ;;  %v191_v14 = vld [vmem:[#allocation7 + $0xe0] sm:$0xff]  ;;  %v190_v16 = vld [vmem:[#allocation7 + $0xd8] sm:$0xff]  ;;  %v189_v18 = vld [vmem:[#allocation7 + $0xd0] sm:$0xff] }
  0x2c   :  { %295 = vmatprep.subr.mxu1 %v193_v9  ;;  %121 = vmatpush1.msra.mxu0 %v61_v8  ;;  %v175_v15 = vld [vmem:[#allocation7 + $0x60] sm:$0xff]  ;;  %v174_v17 = vld [vmem:[#allocation7 + $0x58] sm:$0xff]  ;;  %v173_v19 = vld [vmem:[#allocation7 + $0x50] sm:$0xff] }
  0x2d   :  { %296 = vmatpush3.msra.mxu1 %v177_v10  ;;  %291 = vmatmul.mubr.msk.f32.vlgmr.msra.gmra.mxu0 %vm79_vm1, %v60_v11  ;;  %v188_v20 = vld [vmem:[#allocation7 + $0xc8] sm:$0xff]  ;;  %v187_v22 = vld [vmem:[#allocation7 + $0xc0] sm:$0xff]  ;;  %v186_v24 = vld [vmem:[#allocation7 + $0xb8] sm:$0xff] }
  0x2e   :  { %297 = vmatprep.subr.mxu1 %v192_v12  ;;  %v172_v21 = vld [vmem:[#allocation7 + $0x48] sm:$0xff]  ;;  %v171_v23 = vld [vmem:[#allocation7 + $0x40] sm:$0xff]  ;;  %v170_v25 = vld [vmem:[#allocation7 + $0x38] sm:$0xff] }
  0x2f   :  { %298 = vmatpush3.msra.mxu1 %v176_v13  ;;  %v185_v26 = vld [vmem:[#allocation7 + $0xb0] sm:$0xff]  ;;  %v184_v28 = vld [vmem:[#allocation7 + $0xa8] sm:$0xff]  ;;  %v183_v30 = vld [vmem:[#allocation7 + $0xa0] sm:$0xff] }
  0x30   :  { %299 = vmatprep.subr.mxu1 %v191_v14  ;;  %v169_v27 = vld [vmem:[#allocation7 + $0x30] sm:$0xff]  ;;  %v168_v29 = vld [vmem:[#allocation7 + $0x28] sm:$0xff]  ;;  %v167_v31 = vld [vmem:[#allocation7 + $0x20] sm:$0xff] }
  0x31   :  { %300 = vmatpush3.msra.mxu1 %v175_v15  ;;  %v182_v32 = vld [vmem:[#allocation7 + $0x98] sm:$0xff]  ;;  %v181_v34 = vld [vmem:[#allocation7 + $0x90] sm:$0xff]  ;;  %v180_v36 = vld [vmem:[#allocation7 + $0x88] sm:$0xff] }
  0x32   :  { %301 = vmatprep.subr.mxu1 %v190_v16  ;;  %v166_v33 = vld [vmem:[#allocation7 + $0x18] sm:$0xff]  ;;  %v165_v35 = vld [vmem:[#allocation7 + $0x10] sm:$0xff]  ;;  %v164_v37 = vld [vmem:[#allocation7 + $0x8] sm:$0xff] }
  0x33   :  { %302 = vmatpush3.msra.mxu1 %v174_v17  ;;  %v179_v38 = vld [vmem:[#allocation7 + $0x80] sm:$0xff]  ;;  %v67_v43 = vld [vmem:[%s482_s2] sm:$0x3]  ;;  %s397_s2 = scalar_lea.vmem %s280_s14, 128 }
  0x34   :  { %303 = vmatprep.subr.mxu1 %v189_v18  ;;  %v163_v39 = vld [vmem:[#allocation7] sm:$0xff]  ;;  %v72_v45 = vrot.slane %v67_v43, %v71_v42  ;;  %v76_v46 = vrot.slane %v67_v43, %v75_v44  ;;  %v292_v54 = vld [vmem:[%s484_s4] ss:$0 sm:$0xff]  ;;  %p398_p1 = scmp.ne.s32.totalorder %s280_s14, %s397_s2  ;;  %p403_p3 = scmp.lt.s32.totalorder %s397_s2, %s397_s2 }
  0x35   :  { %304 = vmatpush3.msra.mxu1 %v173_v19 }
  0x36   :  { %305 = vmatprep.subr.mxu1 %v188_v20  ;;  %p404_p4 = por %p403_p3, %p402_p2 }
  0x37   :  { %306 = vmatpush3.msra.mxu1 %v172_v21 }
  0x38   :  { %307 = vmatprep.subr.mxu1 %v187_v22  ;;  %p405_p5 = pnand %p404_p4, %p398_p1 }
  0x39   :  { %308 = vmatpush3.msra.mxu1 %v171_v23 }
  0x3a   :  { %309 = vmatprep.subr.mxu1 %v186_v24 }
  0x3b   :  { %310 = vmatpush3.msra.mxu1 %v170_v25 }
  0x3c   :  { %311 = vmatprep.subr.mxu1 %v185_v26 }
  0x3d   :  { %312 = vmatpush3.msra.mxu1 %v169_v27 }
  0x3e   :  { %313 = vmatprep.subr.mxu1 %v184_v28 }
  0x3f   :  { %314 = vmatpush3.msra.mxu1 %v168_v29 }
  0x40   :  { %315 = vmatprep.subr.mxu1 %v183_v30 }
  0x41   :  { %316 = vmatpush3.msra.mxu1 %v167_v31 }
  0x42   :  { %317 = vmatprep.subr.mxu1 %v182_v32 }
  0x43   :  { %318 = vmatpush3.msra.mxu1 %v166_v33 }
  0x44   :  { %319 = vmatprep.subr.mxu1 %v181_v34 }
  0x45   :  { %320 = vmatpush3.msra.mxu1 %v165_v35 }
  0x46   :  { %321 = vmatprep.subr.mxu1 %v180_v36 }
  0x47   :  { %322 = vmatpush3.msra.mxu1 %v164_v37 }
  0x48   :  { %323 = vmatprep.subr.mxu1 %v179_v38 }
  0x49   :  { %324 = vmatpush3.msra.mxu1 %v163_v39 }
  0xed   :  { %v156_v47 = vpop.f32.mrf.mxu0 }
  0xee   :  { %v157_v48 = vadd.f32 %v156_v47, %v72_v45 }
  0xef   :  { %v158_v49 = vpop.f32.mrf.mxu0 }
  0xf0   :  { %v159_v50 = vadd.f32 %v158_v49, %v76_v46  ;;  %v161_v52 = vmax.f32 %v157_v48, 0.0 }
  0xf2   :  { %v162_v51 = vmax.f32 %v159_v50, 0.0 }
  0xf4   :  { %266 = vmatprep.mubr.f32.mxu1 %v162_v51 }
  0xf5   :  { %267 = vmatmul.mubr.f32.vlgmr.msra.gmra.mxu1 %v161_v52 }
 0x1b5   :  { %v325_v53 = vpop.f32.mrf.mxu1 }
 0x1b7   :  { %v326_v55 = vpop.f32.mrf.mxu1 }
 0x1b8   :  { %v327_v56 = vadd.f32 %v326_v55, %v325_v53 }
 0x1ba   :  { %v269_v57 = vadd.f32 %v327_v56, %v292_v54 }
 0x1bc   :  { %272 = vst [vmem:[#allocation8] sm:$0xff] %v269_v57 }
 0x1bd   :  { %408 = shalt.err (!%p405_p5)
}
 0x1be   :  { %282 = dma.vmem_to_hbm [thread:$0]  %s280_s14, 128, %s485_s5, [#allocation4]  }
 0x1bf   :  { %421 = dma.done.wait [#allocation4], 128  }
 0x1c0   :  { %422 = vsyncadd [#allocation4], 4294967168 }
 0x1c1   :  { %286 = vsyncpa [#allocation3], 1 }
 0x1c2   :  { %287 = vsyncpa [#allocation6], 1 }
 0x1c3   :  { %288 = vsyncpa [#allocation4], 1 }

</bundles_post_ra>
